<compile_context>
chip_gen: v5e
topology: v5e:2x2
jax: 0.10.0
libtpu: 0.0.40
codegen_flags: <defaults>
</compile_context>

<pallas_src>
import jax
import jax.numpy as jnp
from jax.experimental import pallas as pl
from jax.experimental.pallas import tpu as pltpu

IN_DIM = 784
HID_DIM = 64


def _sigmoid(x):
    # sigmoid(x) == 0.5 * tanh(0.5 * x) + 0.5  (single EUP push per element).
    return 0.5 * jnp.tanh(0.5 * x) + 0.5


def _encoder_kernel(x_ref, w1_ref, b1_ref, w2_ref, b2_ref, o_ref):
    # Layer 1: (tb, 784) @ (784, 64) -> (tb, 64); bf16 operands, f32 accum.
    h = jnp.dot(x_ref[...], w1_ref[...], preferred_element_type=jnp.float32)
    h = _sigmoid(h + b1_ref[...])                       # f32 epilogue
    # Layer 2: (tb, 64) @ (64, 784) -> (tb, 784); bf16 operands, f32 accum.
    y = jnp.dot(h.astype(w2_ref.dtype), w2_ref[...],
                preferred_element_type=jnp.float32)
    y = _sigmoid(y + b2_ref[...])
    o_ref[...] = y.astype(o_ref.dtype)


def _round_up(a, m):
    return (a + m - 1) // m * m


def encoder_forward(x, w_enc, b_enc, w_dec, b_dec, *, tile_b=1024):
    """x: (B, 784) -> (B, 784). Weights already in (in, out) layout."""
    B, D = x.shape
    assert D == IN_DIM
    out_dtype = x.dtype

    # bf16 MXU operands; biases stay f32 for the epilogue.
    x = x.astype(jnp.bfloat16)
    w_enc = w_enc.astype(jnp.bfloat16)
    w_dec = w_dec.astype(jnp.bfloat16)
    b_enc = b_enc.astype(jnp.float32).reshape(1, HID_DIM)
    b_dec = b_dec.astype(jnp.float32).reshape(1, IN_DIM)

    # Keep tile_b a multiple of 16 (bf16 sublane packing, covers f32's 8) and
    # no larger than the (padded) batch; pad batch so the grid tiles evenly.
    tile_b = min(tile_b, _round_up(B, 16))
    tile_b = _round_up(tile_b, 16)
    b_pad = _round_up(B, tile_b)
    if b_pad != B:
        x = jnp.pad(x, ((0, b_pad - B), (0, 0)))
    grid = (b_pad // tile_b,)

    cost = pl.CostEstimate(
        flops=2 * 2 * b_pad * IN_DIM * HID_DIM,
        transcendentals=b_pad * (IN_DIM + HID_DIM),
        bytes_accessed=(b_pad * IN_DIM * (2 + jnp.dtype(out_dtype).itemsize)
                        + 2 * IN_DIM * HID_DIM * 2
                        + (IN_DIM + HID_DIM) * 4),
    )

    out = pl.pallas_call(
        _encoder_kernel,
        out_shape=jax.ShapeDtypeStruct((b_pad, IN_DIM), out_dtype),
        grid_spec=pltpu.PrefetchScalarGridSpec(
            num_scalar_prefetch=0,
            grid=grid,
            in_specs=[
                pl.BlockSpec((tile_b, IN_DIM), lambda i: (i, 0)),   # x tile
                pl.BlockSpec((IN_DIM, HID_DIM), lambda i: (0, 0)),  # W_enc
                pl.BlockSpec((1, HID_DIM), lambda i: (0, 0)),       # b_enc
                pl.BlockSpec((HID_DIM, IN_DIM), lambda i: (0, 0)),  # W_dec
                pl.BlockSpec((1, IN_DIM), lambda i: (0, 0)),        # b_dec
            ],
            out_specs=pl.BlockSpec((tile_b, IN_DIM), lambda i: (i, 0)),
        ),
        compiler_params=pltpu.CompilerParams(
            dimension_semantics=("parallel",),
            vmem_limit_bytes=32 * 1024 * 1024,
        ),
        cost_estimate=cost,
    )(x, w_enc, b_enc, w_dec, b_dec)

    return out[:B] if b_pad != B else out


def _init_params(key):
    """Deterministic init; shapes match nn.Linear(784,64) / nn.Linear(64,784)."""
    k1, k2, k3, k4 = jax.random.split(key, 4)
    s1 = 1.0 / jnp.sqrt(IN_DIM)
    s2 = 1.0 / jnp.sqrt(HID_DIM)
    # Stored as (in, out) so the kernel does x @ W (equivalent to x @ W_pt.T).
    w_enc = jax.random.uniform(k1, (IN_DIM, HID_DIM), jnp.float32, -s1, s1)
    b_enc = jax.random.uniform(k2, (1, HID_DIM), jnp.float32, -s1, s1)
    w_dec = jax.random.uniform(k3, (HID_DIM, IN_DIM), jnp.float32, -s2, s2)
    b_dec = jax.random.uniform(k4, (1, IN_DIM), jnp.float32, -s2, s2)
    return w_enc, b_enc, w_dec, b_dec


def _reference(x, w_enc, b_enc, w_dec, b_dec):
    h = jax.nn.sigmoid(x @ w_enc + b_enc)
    return jax.nn.sigmoid(h @ w_dec + b_dec)


if __name__ == "__main__":
    key = jax.random.PRNGKey(0)
    kx, kp = jax.random.split(key)

    batch = 24  # not a multiple of 16 -> exercises the pad-and-slice path
    x = jax.random.normal(kx, (batch, IN_DIM), jnp.float32)
    w_enc, b_enc, w_dec, b_dec = _init_params(kp)

    out = encoder_forward(x, w_enc, b_enc, w_dec, b_dec)
    out = jax.block_until_ready(out)

    ref = _reference(x, w_enc, b_enc, w_dec, b_dec)
    assert out.shape == (batch, IN_DIM)
    # bf16 MXU operands (f32 accumulation) -> loosened tolerance vs f32 ref.
    assert jnp.allclose(out, ref, atol=2e-2, rtol=2e-2)

    print("KERNEL_OK")
</pallas_src>

<mosaic_0001>
module attributes {stable_mosaic.version = 11 : i64} {
  func.func @_encoder_kernel(%arg0: i32, %arg1: memref<32x784xbf16, #tpu.memory_space<vmem>>, %arg2: memref<784x64xbf16, #tpu.memory_space<vmem>>, %arg3: memref<1x64xf32, #tpu.memory_space<vmem>>, %arg4: memref<64x784xbf16, #tpu.memory_space<vmem>>, %arg5: memref<1x784xf32, #tpu.memory_space<vmem>>, %arg6: memref<32x784xf32, #tpu.memory_space<vmem>>) attributes {dimension_semantics = [#tpu.dimension_semantics<parallel>], iteration_bounds = array<i64: 1>, scalar_prefetch = 0 : i64, scratch_operands = 0 : i64, tpu.core_type = #tpu.core_type<tc>, window_params = [{transform_indices = @transform_0, window_bounds = array<i64: 32, 784>}, {pipeline_mode = #tpu.pipeline_mode<synchronous>, transform_indices = @transform_1, window_bounds = array<i64: 784, 64>}, {pipeline_mode = #tpu.pipeline_mode<synchronous>, transform_indices = @transform_2, window_bounds = array<i64: 1, 64>}, {pipeline_mode = #tpu.pipeline_mode<synchronous>, transform_indices = @transform_3, window_bounds = array<i64: 64, 784>}, {pipeline_mode = #tpu.pipeline_mode<synchronous>, transform_indices = @transform_4, window_bounds = array<i64: 1, 784>}, {transform_indices = @transform_5, window_bounds = array<i64: 32, 784>}]} {
    %c0 = arith.constant 0 : index
    %c0_0 = arith.constant 0 : index
    %0 = vector.load %arg1[%c0, %c0_0] : memref<32x784xbf16, #tpu.memory_space<vmem>>, vector<32x784xbf16>
    %c0_1 = arith.constant 0 : index
    %c0_2 = arith.constant 0 : index
    %1 = vector.load %arg2[%c0_1, %c0_2] : memref<784x64xbf16, #tpu.memory_space<vmem>>, vector<784x64xbf16>
    %cst = arith.constant dense<0.000000e+00> : vector<32x64xf32>
    %2 = tpu.matmul %0, %1, %cst {dimension_numbers = #tpu.dot_dimension_numbers<[1], [0], [0], [1], [0, 0, 1, 1], [], []>} : vector<32x784xbf16>, vector<784x64xbf16>, vector<32x64xf32> -> vector<32x64xf32>
    %c0_3 = arith.constant 0 : index
    %c0_4 = arith.constant 0 : index
    %3 = vector.load %arg3[%c0_3, %c0_4] : memref<1x64xf32, #tpu.memory_space<vmem>>, vector<1x64xf32>
    %4 = vector.broadcast %3 : vector<1x64xf32> to vector<32x64xf32>
    %5 = arith.addf %2, %4 : vector<32x64xf32>
    %cst_5 = arith.constant 5.000000e-01 : f32
    %6 = vector.broadcast %cst_5 : f32 to vector<32x64xf32>
    %7 = arith.mulf %6, %5 : vector<32x64xf32>
    %8 = math.tanh %7 : vector<32x64xf32>
    %cst_6 = arith.constant 5.000000e-01 : f32
    %9 = vector.broadcast %cst_6 : f32 to vector<32x64xf32>
    %10 = arith.mulf %9, %8 : vector<32x64xf32>
    %cst_7 = arith.constant 5.000000e-01 : f32
    %11 = vector.broadcast %cst_7 : f32 to vector<32x64xf32>
    %12 = arith.addf %10, %11 : vector<32x64xf32>
    %13 = arith.truncf %12 : vector<32x64xf32> to vector<32x64xbf16>
    %c0_8 = arith.constant 0 : index
    %c0_9 = arith.constant 0 : index
    %14 = vector.load %arg4[%c0_8, %c0_9] : memref<64x784xbf16, #tpu.memory_space<vmem>>, vector<64x784xbf16>
    %cst_10 = arith.constant dense<0.000000e+00> : vector<32x784xf32>
    %15 = tpu.matmul %13, %14, %cst_10 {dimension_numbers = #tpu.dot_dimension_numbers<[1], [0], [0], [1], [0, 0, 1, 1], [], []>} : vector<32x64xbf16>, vector<64x784xbf16>, vector<32x784xf32> -> vector<32x784xf32>
    %c0_11 = arith.constant 0 : index
    %c0_12 = arith.constant 0 : index
    %16 = vector.load %arg5[%c0_11, %c0_12] : memref<1x784xf32, #tpu.memory_space<vmem>>, vector<1x784xf32>
    %17 = vector.broadcast %16 : vector<1x784xf32> to vector<32x784xf32>
    %18 = arith.addf %15, %17 : vector<32x784xf32>
    %cst_13 = arith.constant 5.000000e-01 : f32
    %19 = vector.broadcast %cst_13 : f32 to vector<32x784xf32>
    %20 = arith.mulf %19, %18 : vector<32x784xf32>
    %21 = math.tanh %20 : vector<32x784xf32>
    %cst_14 = arith.constant 5.000000e-01 : f32
    %22 = vector.broadcast %cst_14 : f32 to vector<32x784xf32>
    %23 = arith.mulf %22, %21 : vector<32x784xf32>
    %cst_15 = arith.constant 5.000000e-01 : f32
    %24 = vector.broadcast %cst_15 : f32 to vector<32x784xf32>
    %25 = arith.addf %23, %24 : vector<32x784xf32>
    %c0_16 = arith.constant 0 : index
    %c0_17 = arith.constant 0 : index
    %26 = vector.load %arg6[%c0_16, %c0_17] : memref<32x784xf32, #tpu.memory_space<vmem>>, vector<32x784xf32>
    tpu.vector_store %arg6[%c0_16, %c0_17], %25 {strides = array<i32>} : memref<32x784xf32, #tpu.memory_space<vmem>>, vector<32x784xf32>,
    return
  }
  func.func @transform_0(%arg0: i32) -> (i32, i32) {
    %c0_i32 = arith.constant 0 : i32
    %c0_i32_0 = arith.constant 0 : i32
    return %arg0, %c0_i32 : i32, i32
  }
  func.func @transform_1(%arg0: i32) -> (i32, i32) {
    %c0_i32 = arith.constant 0 : i32
    %c0_i32_0 = arith.constant 0 : i32
    %c0_i32_1 = arith.constant 0 : i32
    return %c0_i32, %c0_i32_0 : i32, i32
  }
  func.func @transform_2(%arg0: i32) -> (i32, i32) {
    %c0_i32 = arith.constant 0 : i32
    %c0_i32_0 = arith.constant 0 : i32
    %c0_i32_1 = arith.constant 0 : i32
    return %c0_i32, %c0_i32_0 : i32, i32
  }
  func.func @transform_3(%arg0: i32) -> (i32, i32) {
    %c0_i32 = arith.constant 0 : i32
    %c0_i32_0 = arith.constant 0 : i32
    %c0_i32_1 = arith.constant 0 : i32
    return %c0_i32, %c0_i32_0 : i32, i32
  }
  func.func @transform_4(%arg0: i32) -> (i32, i32) {
    %c0_i32 = arith.constant 0 : i32
    %c0_i32_0 = arith.constant 0 : i32
    %c0_i32_1 = arith.constant 0 : i32
    return %c0_i32, %c0_i32_0 : i32, i32
  }
  func.func @transform_5(%arg0: i32) -> (i32, i32) {
    %c0_i32 = arith.constant 0 : i32
    %c0_i32_0 = arith.constant 0 : i32
    return %arg0, %c0_i32 : i32, i32
  }
}

</mosaic_0001>

<bundles_post_ra>
// kernel: tpu_custom_call.1
= control target key start
LH: loop header
LB: loop body
LE: loop exit
PB: predicated region body
PF: predicated region fallthrough
CT: control target
= control target key end

     0   :  { %s2293_s0 = inlined_call_operand.vmem [shape: bf16[32,784], index: 0, kind: input, shape index: {}]   ;;  %s2294_s1 = inlined_call_operand.vmem [shape: bf16[784,64], index: 1, kind: input, shape index: {}]   ;;  %s2295_s2 = inlined_call_operand.vmem [shape: f32[1,64], index: 2, kind: input, shape index: {}]   ;;  %s2296_s3 = inlined_call_operand.vmem [shape: bf16[64,784], index: 3, kind: input, shape index: {}]   ;;  %s2297_s4 = inlined_call_operand.vmem [shape: f32[1,784], index: 4, kind: input, shape index: {}]   ;;  %s2298_s5 = inlined_call_operand.hbm [shape: f32[32,784], index: 5, kind: output, shape index: {}]  }
   0x1   :  { %v1553_v0 = vld [vmem:[%s2294_s1 + $0x38] sm:$0xff]  ;;  %v1552_v4 = vld [vmem:[%s2294_s1 + $0x30] sm:$0xff]  ;;  %v1551_v8 = vld [vmem:[%s2294_s1 + $0x28] sm:$0xff] }
   0x2   :  { %v1569_v1 = vld [vmem:[%s2294_s1 + $0xb8] sm:$0xff]  ;;  %511 = vmatpush.bf16.msra.mxu0 %v1553_v0  ;;  %v1568_v5 = vld [vmem:[%s2294_s1 + $0xb0] sm:$0xff]  ;;  %v1567_v9 = vld [vmem:[%s2294_s1 + $0xa8] sm:$0xff] }
   0x3   :  { %v1561_v2 = vld [vmem:[%s2294_s1 + $0x78] sm:$0xff]  ;;  %549 = vmatpush.bf16.msra.mxu2 %v1569_v1  ;;  %v1560_v6 = vld [vmem:[%s2294_s1 + $0x70] sm:$0xff]  ;;  %v1559_v10 = vld [vmem:[%s2294_s1 + $0x68] sm:$0xff] }
   0x4   :  { %v1577_v3 = vld [vmem:[%s2294_s1 + $0xf8] sm:$0xff]  ;;  %530 = vmatpush.bf16.msra.mxu1 %v1561_v2  ;;  %v1576_v7 = vld [vmem:[%s2294_s1 + $0xf0] sm:$0xff]  ;;  %v1575_v11 = vld [vmem:[%s2294_s1 + $0xe8] sm:$0xff] }
   0x5   :  { %568 = vmatpush.bf16.msra.mxu3 %v1577_v3  ;;  %v1550_v12 = vld [vmem:[%s2294_s1 + $0x20] sm:$0xff]  ;;  %v1549_v16 = vld [vmem:[%s2294_s1 + $0x18] sm:$0xff]  ;;  %v1548_v20 = vld [vmem:[%s2294_s1 + $0x10] sm:$0xff] }
   0x6   :  { %512 = vmatpush.bf16.msra.mxu0 %v1552_v4  ;;  %v1566_v13 = vld [vmem:[%s2294_s1 + $0xa0] sm:$0xff]  ;;  %v1565_v17 = vld [vmem:[%s2294_s1 + $0x98] sm:$0xff]  ;;  %v1564_v21 = vld [vmem:[%s2294_s1 + $0x90] sm:$0xff] }
   0x7   :  { %550 = vmatpush.bf16.msra.mxu2 %v1568_v5  ;;  %v1558_v14 = vld [vmem:[%s2294_s1 + $0x60] sm:$0xff]  ;;  %v1557_v18 = vld [vmem:[%s2294_s1 + $0x58] sm:$0xff]  ;;  %v1556_v22 = vld [vmem:[%s2294_s1 + $0x50] sm:$0xff] }
   0x8   :  { %531 = vmatpush.bf16.msra.mxu1 %v1560_v6  ;;  %v1574_v15 = vld [vmem:[%s2294_s1 + $0xe0] sm:$0xff]  ;;  %v1573_v19 = vld [vmem:[%s2294_s1 + $0xd8] sm:$0xff]  ;;  %v1572_v23 = vld [vmem:[%s2294_s1 + $0xd0] sm:$0xff] }
   0x9   :  { %569 = vmatpush.bf16.msra.mxu3 %v1576_v7 }
   0xa   :  { %513 = vmatpush.bf16.msra.mxu0 %v1551_v8 }
   0xb   :  { %551 = vmatpush.bf16.msra.mxu2 %v1567_v9 }
   0xc   :  { %532 = vmatpush.bf16.msra.mxu1 %v1559_v10 }
   0xd   :  { %570 = vmatpush.bf16.msra.mxu3 %v1575_v11 }
   0xe   :  { %514 = vmatpush.bf16.msra.mxu0 %v1550_v12 }
   0xf   :  { %552 = vmatpush.bf16.msra.mxu2 %v1566_v13 }
  0x10   :  { %533 = vmatpush.bf16.msra.mxu1 %v1558_v14 }
  0x11   :  { %571 = vmatpush.bf16.msra.mxu3 %v1574_v15 }
  0x12   :  { %515 = vmatpush.bf16.msra.mxu0 %v1549_v16 }
  0x13   :  { %553 = vmatpush.bf16.msra.mxu2 %v1565_v17 }
  0x14   :  { %534 = vmatpush.bf16.msra.mxu1 %v1557_v18 }
  0x15   :  { %572 = vmatpush.bf16.msra.mxu3 %v1573_v19 }
  0x16   :  { %10 = vsyncpa [#allocation3], 0  ;;  %516 = vmatpush.bf16.msra.mxu0 %v1548_v20  ;;  %v1547_v24 = vld [vmem:[%s2294_s1 + $0x8] sm:$0xff]  ;;  %v1546_v28 = vld [vmem:[%s2294_s1] sm:$0xff]  ;;  %vm504_vm0 = vcmask 130048   ;;  %vm854_vm1 = vcmask 523264  }
  0x17   :  { %554 = vmatpush.bf16.msra.mxu2 %v1564_v21  ;;  %v1563_v25 = vld [vmem:[%s2294_s1 + $0x88] sm:$0xff]  ;;  %v1562_v29 = vld [vmem:[%s2294_s1 + $0x80] sm:$0xff]  ;;  %v1535_v33 = vld [vmem:[%s2293_s0 + $0x18] sm:$0xf0]  ;;  %s1140_s26 = sshll.u32 %s2298_s5, 4  ;;  %s1734_s27 = smov 896   ;;  %s1141_s26 = int_to_ptr.hbm [resolvable:$true] %s1140_s26 }
  0x18   :  { %535 = vmatpush.bf16.msra.mxu1 %v1556_v22  ;;  %v1555_v26 = vld [vmem:[%s2294_s1 + $0x48] sm:$0xff]  ;;  %v1554_v30 = vld [vmem:[%s2294_s1 + $0x40] sm:$0xff]  ;;  %v1585_v40 = vld [vmem:[%s2294_s1 + $0x138] sm:$0xff]  ;;  %s1735_s28 = smov 56  }
  0x19   :  { %573 = vmatpush.bf16.msra.mxu3 %v1572_v23  ;;  %v1571_v27 = vld [vmem:[%s2294_s1 + $0xc8] sm:$0xff]  ;;  %v1570_v31 = vld [vmem:[%s2294_s1 + $0xc0] sm:$0xff]  ;;  %v1593_v45 = vld [vmem:[%s2294_s1 + $0x178] sm:$0xff] }
  0x1a   :  { %v1154_v32 = vld [vmem:[%s2293_s0] sm:$0xf]  ;;  %517 = vmatpush.bf16.msra.mxu0 %v1547_v24  ;;  %v1162_v34 = vld [vmem:[%s2293_s0 + $0x8] sm:$0xf]  ;;  %v1536_v35 = vld [vmem:[%s2293_s0 + $0x20] sm:$0xf0] }
  0x1b   :  { %555 = vmatpush.bf16.msra.mxu2 %v1563_v25  ;;  %v1532_v36 = vld [vmem:[%s2293_s0 + $0x4] sm:$0xf]  ;;  %v1156_v37 = vld [vmem:[%s2293_s0 + $0x1c] sm:$0xf0]  ;;  %v1533_v38 = vld [vmem:[%s2293_s0 + $0xc] sm:$0xf]  ;;  %v1155_v41 = vor.u32 %v1535_v33, %v1154_v32  ;;  %v1163_v42 = vor.u32 %v1536_v35, %v1162_v34 }
  0x1c   :  { %536 = vmatpush.bf16.msra.mxu1 %v1555_v26  ;;  %v1164_v39 = vld [vmem:[%s2293_s0 + $0x24] sm:$0xf0]  ;;  %v1159_v43 = vor.u32 %v1532_v36, %v1156_v37  ;;  %v1584_v46 = vld [vmem:[%s2294_s1 + $0x130] sm:$0xff]  ;;  %v1582_v50 = vld [vmem:[%s2294_s1 + $0x120] sm:$0xff] }
  0x1d   :  { %574 = vmatpush.bf16.msra.mxu3 %v1571_v27  ;;  %v1167_v44 = vor.u32 %v1533_v38, %v1164_v39  ;;  %v1592_v47 = vld [vmem:[%s2294_s1 + $0x170] sm:$0xff]  ;;  %v1583_v48 = vld [vmem:[%s2294_s1 + $0x128] sm:$0xff]  ;;  %v1590_v51 = vld [vmem:[%s2294_s1 + $0x160] sm:$0xff] }
  0x1e   :  { %518 = vmatpush.bf16.msra.mxu0 %v1546_v28  ;;  %v1591_v49 = vld [vmem:[%s2294_s1 + $0x168] sm:$0xff]  ;;  %v1182_v52 = vld [vmem:[%s2293_s0 + $0x38] sm:$0xf]  ;;  %v1542_v53 = vld [vmem:[%s2293_s0 + $0x50] sm:$0xf0] }
  0x1f   :  { %556 = vmatpush.bf16.msra.mxu2 %v1562_v29  ;;  %v1190_v54 = vld [vmem:[%s2293_s0 + $0x40] sm:$0xf]  ;;  %v1543_v55 = vld [vmem:[%s2293_s0 + $0x58] sm:$0xf0]  ;;  %v1184_v57 = vld [vmem:[%s2293_s0 + $0x54] sm:$0xf0]  ;;  %v1183_v61 = vor.u32 %v1542_v53, %v1182_v52 }
  0x20   :  { %537 = vmatpush.bf16.msra.mxu1 %v1554_v30  ;;  %v1539_v56 = vld [vmem:[%s2293_s0 + $0x3c] sm:$0xf]  ;;  %v1540_v58 = vld [vmem:[%s2293_s0 + $0x44] sm:$0xf]  ;;  %v1192_v59 = vld [vmem:[%s2293_s0 + $0x5c] sm:$0xf0]  ;;  %v1191_v62 = vor.u32 %v1543_v55, %v1190_v54 }
  0x21   :  { %575 = vmatpush.bf16.msra.mxu3 %v1570_v31  ;;  %519 = vmatmul.bf16.vlgmr.msra.gmra.mxu0 %v1155_v41  ;;  %v1581_v60 = vld [vmem:[%s2294_s1 + $0x118] sm:$0xff]  ;;  %v1187_v63 = vor.u32 %v1539_v56, %v1184_v57  ;;  %v1195_v0 = vor.u32 %v1540_v58, %v1192_v59  ;;  %v1580_v2 = vld [vmem:[%s2294_s1 + $0x110] sm:$0xff]  ;;  %v1579_v4 = vld [vmem:[%s2294_s1 + $0x108] sm:$0xff] }
  0x22   :  { %587 = vmatpush.bf16.msrb.mxu0 %v1585_v40  ;;  %557 = vmatmul.bf16.vlgmr.msra.gmra.mxu2 %v1163_v42  ;;  %v1589_v1 = vld [vmem:[%s2294_s1 + $0x158] sm:$0xff]  ;;  %v1588_v3 = vld [vmem:[%s2294_s1 + $0x150] sm:$0xff]  ;;  %v1587_v5 = vld [vmem:[%s2294_s1 + $0x148] sm:$0xff] }
  0x23   :  { %1623 = vmatpush.bf16.msrb.mxu2 %v1585_v40  ;;  %538 = vmatmul.bf16.vlgmr.msra.gmra.mxu1 %v1159_v43  ;;  %v1578_v6 = vld [vmem:[%s2294_s1 + $0x100] sm:$0xff]  ;;  %v1170_v8 = vld [vmem:[%s2293_s0 + $0x10] sm:$0xf]  ;;  %v1537_v9 = vld [vmem:[%s2293_s0 + $0x28] sm:$0xf0] }
  0x24   :  { %576 = vmatmul.bf16.vlgmr.msra.gmra.mxu3 %v1167_v44  ;;  %606 = vmatpush.bf16.msrb.mxu1 %v1593_v45  ;;  %v1586_v7 = vld [vmem:[%s2294_s1 + $0x140] sm:$0xff]  ;;  %v1198_v11 = vld [vmem:[%s2293_s0 + $0x48] sm:$0xf]  ;;  %v1534_v13 = vld [vmem:[%s2293_s0 + $0x14] sm:$0xf]  ;;  %v1171_v17 = vor.u32 %v1537_v9, %v1170_v8 }
  0x25   :  { %1631 = vmatpush.bf16.msrb.mxu3 %v1593_v45  ;;  %v1594_v10 = vld [vmem:[%s2294_s1 + $0x180] sm:$0xff]  ;;  %v1172_v14 = vld [vmem:[%s2293_s0 + $0x2c] sm:$0xf0]  ;;  %v1541_v15 = vld [vmem:[%s2293_s0 + $0x4c] sm:$0xf] }
  0x26   :  { %588 = vmatpush.bf16.msrb.mxu0 %v1584_v46  ;;  %v1544_v12 = vld [vmem:[%s2293_s0 + $0x60] sm:$0xf0]  ;;  %v1200_v16 = vld [vmem:[%s2293_s0 + $0x64] sm:$0xf0]  ;;  %v1175_v19 = vor.u32 %v1534_v13, %v1172_v14  ;;  %v1178_v21 = vld [vmem:[%s2293_s0 + $0x18] sm:$0xf] }
  0x27   :  { %1624 = vmatpush.bf16.msrb.mxu2 %v1584_v46  ;;  %v1199_v18 = vor.u32 %v1544_v12, %v1198_v11  ;;  %v1203_v20 = vor.u32 %v1541_v15, %v1200_v16  ;;  %v1538_v22 = vld [vmem:[%s2293_s0 + $0x30] sm:$0xf0]  ;;  %v1206_v24 = vld [vmem:[%s2293_s0 + $0x50] sm:$0xf]  ;;  %v1545_v25 = vld [vmem:[%s2293_s0 + $0x68] sm:$0xf0] }
  0x28   :  { %607 = vmatpush.bf16.msrb.mxu1 %v1592_v47  ;;  %v1179_v23 = vor.u32 %v1538_v22, %v1178_v21  ;;  %v1207_v26 = vor.u32 %v1545_v25, %v1206_v24  ;;  %v2018_v37 = vld [vmem:[%s2295_s2] ss:$0 sm:$0xff]  ;;  %v1492_v39 = vld [vmem:[%s2296_s3 + $0xa8] sm:$0xf]  ;;  %v1619_v40 = vld [vmem:[%s2296_s3 + $0xc0] sm:$0xf0] }
  0x29   :  { %1632 = vmatpush.bf16.msrb.mxu3 %v1592_v47  ;;  %v1616_v41 = vld [vmem:[%s2296_s3 + $0xac] sm:$0xf]  ;;  %v1493_v42 = vor.u32 %v1619_v40, %v1492_v39  ;;  %v1494_v43 = vld [vmem:[%s2296_s3 + $0xc4] sm:$0xf0]  ;;  %v1500_v44 = vld [vmem:[%s2296_s3 + $0xb0] sm:$0xf] }
  0x2a   :  { %589 = vmatpush.bf16.msrb.mxu0 %v1583_v48  ;;  %v1620_v45 = vld [vmem:[%s2296_s3 + $0xc8] sm:$0xf0]  ;;  %v1497_v46 = vor.u32 %v1616_v41, %v1494_v43  ;;  %v1464_v53 = vld [vmem:[%s2296_s3 + $0x70] sm:$0xf]  ;;  %v1609_v55 = vld [vmem:[%s2296_s3 + $0x74] sm:$0xf] }
  0x2b   :  { %1625 = vmatpush.bf16.msrb.mxu2 %v1583_v48  ;;  %v1501_v47 = vor.u32 %v1620_v45, %v1500_v44  ;;  %v1617_v48 = vld [vmem:[%s2296_s3 + $0xb4] sm:$0xf]  ;;  %v1612_v54 = vld [vmem:[%s2296_s3 + $0x88] sm:$0xf0]  ;;  %v1466_v58 = vld [vmem:[%s2296_s3 + $0x8c] sm:$0xf0] }
  0x2c   :  { %608 = vmatpush.bf16.msrb.mxu1 %v1591_v49  ;;  %v1465_v57 = vor.u32 %v1612_v54, %v1464_v53  ;;  %v1472_v59 = vld [vmem:[%s2296_s3 + $0x78] sm:$0xf]  ;;  %v1606_v11 = vld [vmem:[%s2296_s3 + $0x58] sm:$0xf0]  ;;  %v1603_v14 = vld [vmem:[%s2296_s3 + $0x44] sm:$0xf] }
  0x2d   :  { %1633 = vmatpush.bf16.msrb.mxu3 %v1591_v49  ;;  %v1502_v49 = vld [vmem:[%s2296_s3 + $0xcc] sm:$0xf0]  ;;  %v1438_v9 = vld [vmem:[%s2296_s3 + $0x54] sm:$0xf0]  ;;  %v1446_v15 = vld [vmem:[%s2296_s3 + $0x5c] sm:$0xf0] }
  0x2e   :  { %590 = vmatpush.bf16.msrb.mxu0 %v1582_v50  ;;  %v1449_v16 = vor.u32 %v1603_v14, %v1446_v15  ;;  %v1410_v24 = vld [vmem:[%s2296_s3 + $0x1c] sm:$0xf0]  ;;  %v1416_v25 = vld [vmem:[%s2296_s3 + $0x8] sm:$0xf]  ;;  %v1615_v14 = vld [vmem:[%s2296_s3 + $0xa0] sm:$0xf0] }
  0x2f   :  { %1626 = vmatpush.bf16.msrb.mxu2 %v1582_v50  ;;  %v1418_v39 = vld [vmem:[%s2296_s3 + $0x24] sm:$0xf0] }
  0x30   :  { %609 = vmatpush.bf16.msrb.mxu1 %v1590_v51 }
  0x31   :  { %1634 = vmatpush.bf16.msrb.mxu3 %v1590_v51  ;;  %524 = vmatmul.bf16.gmra.mxu0 %v1183_v61  ;;  %v1505_v51 = vor.u32 %v1617_v48, %v1502_v49  ;;  %v1469_v61 = vor.u32 %v1609_v55, %v1466_v58 }
  0x32   :  { %591 = vmatpush.bf16.msrb.mxu0 %v1581_v60  ;;  %562 = vmatmul.bf16.gmra.mxu2 %v1191_v62 }
  0x33   :  { %1627 = vmatpush.bf16.msrb.mxu2 %v1581_v60  ;;  %543 = vmatmul.bf16.gmra.mxu1 %v1187_v63  ;;  %v1613_v60 = vld [vmem:[%s2296_s3 + $0x90] sm:$0xf0]  ;;  %v1610_v63 = vld [vmem:[%s2296_s3 + $0x7c] sm:$0xf] }
  0x34   :  { %581 = vmatmul.bf16.gmra.mxu3 %v1195_v0  ;;  %610 = vmatpush.bf16.msrb.mxu1 %v1589_v1  ;;  %v1473_v62 = vor.u32 %v1613_v60, %v1472_v59  ;;  %v1474_v0 = vld [vmem:[%s2296_s3 + $0x94] sm:$0xf0] }
  0x35   :  { %1635 = vmatpush.bf16.msrb.mxu3 %v1589_v1  ;;  %v1477_v1 = vor.u32 %v1610_v63, %v1474_v0  ;;  %v1516_v63 = vld [vmem:[%s2296_s3 + $0xc0] sm:$0xf]  ;;  %v1622_v0 = vld [vmem:[%s2296_s3 + $0xd8] sm:$0xf0] }
  0x36   :  { %592 = vmatpush.bf16.msrb.mxu0 %v1580_v2 }
  0x37   :  { %1628 = vmatpush.bf16.msrb.mxu2 %v1580_v2 }
  0x38   :  { %611 = vmatpush.bf16.msrb.mxu1 %v1588_v3 }
  0x39   :  { %1636 = vmatpush.bf16.msrb.mxu3 %v1588_v3 }
  0x3a   :  { %593 = vmatpush.bf16.msrb.mxu0 %v1579_v4 }
  0x3b   :  { %1629 = vmatpush.bf16.msrb.mxu2 %v1579_v4  ;;  %v1436_v4 = vld [vmem:[%s2296_s3 + $0x38] sm:$0xf] }
  0x3c   :  { %612 = vmatpush.bf16.msrb.mxu1 %v1587_v5 }
  0x3d   :  { %1637 = vmatpush.bf16.msrb.mxu3 %v1587_v5  ;;  %v1605_v5 = vld [vmem:[%s2296_s3 + $0x50] sm:$0xf0] }
  0x3e   :  { %594 = vmatpush.bf16.msrb.mxu0 %v1578_v6  ;;  %v1437_v8 = vor.u32 %v1605_v5, %v1436_v4  ;;  %v1517_v5 = vor.u32 %v1622_v0, %v1516_v63 }
  0x3f   :  { %1630 = vmatpush.bf16.msrb.mxu2 %v1578_v6  ;;  %v1602_v6 = vld [vmem:[%s2296_s3 + $0x3c] sm:$0xf] }
  0x40   :  { %613 = vmatpush.bf16.msrb.mxu1 %v1586_v7  ;;  %v1441_v12 = vor.u32 %v1602_v6, %v1438_v9  ;;  %v1614_v6 = vld [vmem:[%s2296_s3 + $0x98] sm:$0xf0] }
  0x41   :  { %1638 = vmatpush.bf16.msrb.mxu3 %v1586_v7  ;;  %595 = vmatmul.bf16.vlgmr.msrb.gmra.mxu0 %v1171_v17  ;;  %v1408_v17 = vld [vmem:[%s2296_s3] sm:$0xf] }
  0x42   :  { %600 = vmatmul.bf16.vlgmr.msrb.gmra.mxu2 %v1199_v18  ;;  %884 = vmatpush.bf16.msra.mxu0 %v1497_v46  ;;  %v1598_v18 = vld [vmem:[%s2296_s3 + $0x18] sm:$0xf0] }
  0x43   :  { %632 = vmatpush.bf16.msra.mxu2 %v1594_v10  ;;  %614 = vmatmul.bf16.vlgmr.msrb.gmra.mxu1 %v1175_v19  ;;  %v1444_v10 = vld [vmem:[%s2296_s3 + $0x40] sm:$0xf]  ;;  %v1595_v19 = vld [vmem:[%s2296_s3 + $0x4] sm:$0xf] }
  0x44   :  { %619 = vmatmul.bf16.vlgmr.msrb.gmra.mxu3 %v1203_v20  ;;  %903 = vmatpush.bf16.msra.mxu1 %v1501_v47  ;;  %v1445_v13 = vor.u32 %v1606_v11, %v1444_v10  ;;  %v1482_v11 = vld [vmem:[%s2296_s3 + $0x9c] sm:$0xf0] }
  0x45   :  { %865 = vmatpush.bf16.msra.mxu3 %v1493_v42 }
  0x46   :  { %885 = vmatpush.bf16.msra.mxu0 %v1469_v61 }
  0x47   :  { %922 = vmatpush.bf16.msrb.mxu2 %v1505_v51 }
  0x48   :  { %904 = vmatpush.bf16.msra.mxu1 %v1473_v62  ;;  %v1510_v62 = vld [vmem:[%s2296_s3 + $0xd4] sm:$0xf0] }
  0x49   :  { %866 = vmatpush.bf16.msra.mxu3 %v1465_v57 }
  0x4a   :  { %886 = vmatpush.bf16.msra.mxu0 %v1441_v12  ;;  %v1488_v12 = vld [vmem:[%s2296_s3 + $0x88] sm:$0xf] }
  0x4b   :  { %923 = vmatpush.bf16.msrb.mxu2 %v1477_v1 }
  0x4c   :  { %905 = vmatpush.bf16.msra.mxu1 %v1445_v13 }
  0x4d   :  { %867 = vmatpush.bf16.msra.mxu3 %v1437_v8 }
  0x4f   :  { %924 = vmatpush.bf16.msrb.mxu2 %v1449_v16  ;;  %v1489_v16 = vor.u32 %v1615_v14, %v1488_v12 }
  0x52   :  { %1404 = vmatmul.msk.bf16.vlgmr.msra.gmra.mxu2 %vm504_vm0, %v1179_v23  ;;  %v1409_v23 = vor.u32 %v1598_v18, %v1408_v17  ;;  %v1607_v17 = vld [vmem:[%s2296_s3 + $0x60] sm:$0xf0]  ;;  %v1604_v18 = vld [vmem:[%s2296_s3 + $0x4c] sm:$0xf] }
  0x54   :  { %868 = vmatpush.bf16.msra.mxu3 %v1409_v23 }
  0x62   :  { %1405 = vmatmul.msk.bf16.gmra.mxu2 %vm504_vm0, %v1207_v26  ;;  %v1599_v26 = vld [vmem:[%s2296_s3 + $0x20] sm:$0xf0] }
  0x9e   :  { %v520_v27 = vpop.f32.mrf.mxu0 }
  0x9f   :  { %v521_v56 = vadd.f32 %v2018_v37, %v520_v27 }
  0xa0   :  { %v539_v29 = vpop.f32.mrf.mxu1 }
  0xa1   :  { %v540_v7 = vadd.f32 %v539_v29, %v521_v56  ;;  %v1417_v29 = vor.u32 %v1599_v26, %v1416_v25 }
  0xa3   :  { %906 = vmatpush.bf16.msra.mxu1 %v1417_v29  ;;  %v1597_v29 = vld [vmem:[%s2296_s3 + $0x14] sm:$0xf] }
  0xa5   :  { %v1999_v28 = vpop.f32.mrf.mxu2 }
  0xa6   :  { %v2001_v30 = vpop.f32.mrf.mxu0  ;;  %v559_v20 = vadd.f32 %v1999_v28, %v540_v7  ;;  %v1413_v28 = vor.u32 %v1595_v19, %v1410_v24  ;;  %v1611_v7 = vld [vmem:[%s2296_s3 + $0x84] sm:$0xf]  ;;  %v1454_v19 = vld [vmem:[%s2296_s3 + $0x64] sm:$0xf0] }
  0xa7   :  { %v2009_v34 = vpop.f32.mrf.mxu3  ;;  %v523_v21 = vadd.f32 %v2018_v37, %v2001_v30  ;;  %v1596_v30 = vld [vmem:[%s2296_s3 + $0xc] sm:$0xf]  ;;  %979 = vmatpush.bf16.msrb.mxu1 %v1517_v5  ;;  %v1485_v13 = vor.u32 %v1611_v7, %v1482_v11  ;;  %v1457_v25 = vor.u32 %v1604_v18, %v1454_v19 }
  0xa8   :  { %v2005_v32 = vpop.f32.mrf.mxu1  ;;  %v1421_v40 = vor.u32 %v1596_v30, %v1418_v39  ;;  %887 = vmatpush.bf16.msra.mxu0 %v1413_v28  ;;  %v578_v42 = vadd.f32 %v2009_v34, %v559_v20  ;;  %v1460_v20 = vld [vmem:[%s2296_s3 + $0x50] sm:$0xf]  ;;  %v1600_v28 = vld [vmem:[%s2296_s3 + $0x28] sm:$0xf0] }
  0xa9   :  { %v542_v43 = vadd.f32 %v2005_v32, %v523_v21 }
  0xaa   :  { %925 = vmatpush.bf16.msrb.mxu2 %v1421_v40  ;;  %v1426_v40 = vld [vmem:[%s2296_s3 + $0x2c] sm:$0xf0] }
  0xab   :  { %980 = vmatpush.bf16.msrb.mxu1 %v1489_v16 }
  0xad   :  { %v2003_v31 = vpop.f32.mrf.mxu2 }
  0xae   :  { %v2011_v35 = vpop.f32.mrf.mxu0  ;;  %v561_v47 = vadd.f32 %v2003_v31, %v542_v43  ;;  %v1601_v43 = vld [vmem:[%s2296_s3 + $0x30] sm:$0xf0] }
  0xaf   :  { %v2046_v50 = vpop.f32.mrf.mxu3  ;;  %v526_v46 = vadd.f32 %v2018_v37, %v2011_v35 }
  0xb0   :  { %v2013_v36 = vpop.f32.mrf.mxu1  ;;  %v580_v55 = vadd.f32 %v2046_v50, %v561_v47  ;;  %v1621_v50 = vld [vmem:[%s2296_s3 + $0xd0] sm:$0xf0] }
  0xb1   :  { %v545_v51 = vadd.f32 %v2013_v36, %v526_v46  ;;  %v1508_v36 = vld [vmem:[%s2296_s3 + $0xb8] sm:$0xf] }
  0xb5   :  { %v2007_v33 = vpop.f32.mrf.mxu2 }
  0xb6   :  { %v2048_v52 = vpop.f32.mrf.mxu0  ;;  %v564_v32 = vadd.f32 %v2007_v33, %v545_v51  ;;  %v1618_v33 = vld [vmem:[%s2296_s3 + $0xbc] sm:$0xf]  ;;  %v1429_v51 = vor.u32 %v1597_v29, %v1426_v40 }
  0xb7   :  { %v582_v22 = vpop.f32.mrf.mxu3  ;;  %v528_v58 = vadd.f32 %v2018_v37, %v2048_v52  ;;  %v1509_v52 = vor.u32 %v1621_v50, %v1508_v36  ;;  %v1513_v4 = vor.u32 %v1618_v33, %v1510_v62 }
  0xb8   :  { %v2075_v2 = vpop.f32.mrf.mxu1  ;;  %v583_v60 = vadd.f32 %v582_v22, %v564_v32 }
  0xb9   :  { %v547_v61 = vadd.f32 %v2075_v2, %v528_v58  ;;  %v1480_v2 = vld [vmem:[%s2296_s3 + $0x80] sm:$0xf]  ;;  %941 = vmatpush.bf16.msrb.mxu3 %v1509_v52  ;;  %960 = vmatpush.bf16.msrb.mxu0 %v1513_v4 }
  0xba   :  { %v1481_v10 = vor.u32 %v1614_v6, %v1480_v2 }
  0xbd   :  { %v2020_v38 = vpop.f32.mrf.mxu2  ;;  %942 = vmatpush.bf16.msrb.mxu3 %v1481_v10  ;;  %961 = vmatpush.bf16.msrb.mxu0 %v1485_v13 }
  0xbe   :  { %v596_v27 = vpop.f32.mrf.mxu0  ;;  %v566_v15 = vadd.f32 %v2020_v38, %v547_v61  ;;  %v1608_v38 = vld [vmem:[%s2296_s3 + $0x68] sm:$0xf0]  ;;  %v2235_v61 = vld [vmem:[%s2297_s4] sm:$0x7f]  ;;  %s1733_s4 = smov [#allocation2]  }
  0xbf   :  { %v597_v45 = vadd.f32 %v596_v27, %v578_v42  ;;  %v584_v48 = vpop.f32.mrf.mxu3  ;;  %v1461_v26 = vor.u32 %v1608_v38, %v1460_v20  ;;  %v1424_v27 = vld [vmem:[%s2296_s3 + $0x10] sm:$0xf]  ;;  %v1432_v42 = vld [vmem:[%s2296_s3 + $0x18] sm:$0xf]  ;;  %v2241_v52 = vperm.slane %v2235_v61, 2  ;;  %v2246_v5 = vperm.slane %v2235_v61, 0 }
  0xc0   :  { %v615_v44 = vpop.f32.mrf.mxu1  ;;  %v585_v30 = vadd.f32 %v584_v48, %v566_v15  ;;  %v1425_v47 = vor.u32 %v1600_v28, %v1424_v27  ;;  %v2249_v6 = vperm.slane %v2235_v61, 3  ;;  %s1138_s23 = sshll.u32 %s1733_s4, 4  ;;  %s1139_s23 = int_to_ptr.vmem [resolvable:$true] %s1138_s23 }
  0xc1   :  { %v616_v49 = vadd.f32 %v615_v44, %v597_v45  ;;  %962 = vmatpush.bf16.msrb.mxu0 %v1457_v25  ;;  %981 = vmatpush.bf16.msrb.mxu1 %v1461_v26 }
  0xc5   :  { %v2077_v3 = vpop.f32.mrf.mxu2  ;;  %963 = vmatpush.bf16.msrb.mxu0 %v1429_v51 }
  0xc6   :  { %v598_v53 = vpop.f32.mrf.mxu0  ;;  %v602_v8 = vadd.f32 %v2077_v3, %v583_v60  ;;  %v1452_v3 = vld [vmem:[%s2296_s3 + $0x48] sm:$0xf] }
  0xc7   :  { %v599_v34 = vadd.f32 %v598_v53, %v580_v55  ;;  %v620_v1 = vpop.f32.mrf.mxu3  ;;  %v1453_v23 = vor.u32 %v1607_v17, %v1452_v3  ;;  %v1433_v53 = vor.u32 %v1601_v43, %v1432_v42 }
  0xc8   :  { %v617_v57 = vpop.f32.mrf.mxu1  ;;  %v621_v22 = vadd.f32 %v620_v1, %v602_v8 }
  0xc9   :  { %v618_v35 = vadd.f32 %v617_v57, %v599_v34  ;;  %943 = vmatpush.bf16.msrb.mxu3 %v1453_v23  ;;  %982 = vmatpush.bf16.msrb.mxu1 %v1433_v53 }
  0xcd   :  { %v2130_v41 = vpop.f32.mrf.mxu2  ;;  %944 = vmatpush.bf16.msrb.mxu3 %v1425_v47 }
  0xce   :  { %v604_v46 = vadd.f32 %v2130_v41, %v585_v30 }
  0xcf   :  { %v622_v48 = vpop.f32.mrf.mxu3 }
  0xd0   :  { %v623_v34 = vadd.f32 %v622_v48, %v604_v46 }
  0xd5   :  { %v634_v54 = vpop.f32.mrf.mxu2 }
  0xd6   :  { %v635_v56 = vadd.f32 %v634_v54, %v616_v49 }
  0xd8   :  { %v644_v59 = vmul.f32 0.5, %v635_v56 }
  0xda   :  { %1643 = vtanh.f32 %v644_v59 }
  0xdd   :  { %v636_v31 = vpop.f32.mrf.mxu2 }
  0xde   :  { %v637_v37 = vadd.f32 %v636_v31, %v618_v35 }
  0xe0   :  { %v645_v9 = vmul.f32 0.5, %v637_v37  ;;  %v1644_v21 = vpop.eup %1643  ;;  %v2238_v37 = vperm.slane %v2235_v61, 1 }
  0xe1   :  { %v652_v44 = vmul.f32 0.5, %v1644_v21 }
  0xe2   :  { %1645 = vtanh.f32 %v645_v9 }
  0xe3   :  { %v656_v55 = vadd.f32 0.5, %v652_v44 }
  0xe5   :  { %v639_v24 = vpop.f32.mrf.mxu2 }
  0xe6   :  { %v640_v39 = vadd.f32 %v639_v24, %v621_v22 }
  0xe8   :  { %v1646_v45 = vpop.eup %1645  ;;  %v646_v54 = vmul.f32 0.5, %v640_v39 }
  0xe9   :  { %v653_v49 = vmul.f32 0.5, %v1646_v45 }
  0xea   :  { %1647 = vtanh.f32 %v646_v54 }
  0xeb   :  { %v657_v56 = vadd.f32 0.5, %v653_v49 }
  0xed   :  { %v660_v32 = vpack.c.bf16 %v657_v56, %v656_v55  ;;  %v641_v57 = vpop.f32.mrf.mxu2 }
  0xee   :  { %v642_v41 = vadd.f32 %v641_v57, %v623_v34 }
  0xef   :  { %1518 = vmatmul.msk.bf16.vlgmr.msra.gmra.mxu3 %vm854_vm1, %v660_v32  ;;  %1520 = vmatmul.msk.bf16.vlgmr.msra.gmra.mxu0 %vm854_vm1, %v660_v32 }
  0xf0   :  { %v647_v58 = vmul.f32 0.5, %v642_v41  ;;  %1522 = vmatmul.msk.bf16.vlgmr.msra.gmra.mxu1 %vm854_vm1, %v660_v32  ;;  %1524 = vmatmul.msk.bf16.vlgmr.msrb.gmra.mxu2 %vm854_vm1, %v660_v32  ;;  %v1648_v59 = vpop.eup %1647 }
  0xf1   :  { %v654_v35 = vmul.f32 0.5, %v1648_v59 }
  0xf2   :  { %1649 = vtanh.f32 %v647_v58 }
  0xf3   :  { %v658_v36 = vadd.f32 0.5, %v654_v35 }
  0xf8   :  { %v1650_v60 = vpop.eup %1649 }
  0xf9   :  { %v655_v31 = vmul.f32 0.5, %v1650_v60 }
  0xfb   :  { %v659_v50 = vadd.f32 0.5, %v655_v31 }
  0xfd   :  { %v661_v33 = vpack.c.bf16 %v659_v50, %v658_v36 }
  0xff   :  { %1519 = vmatmul.msk.bf16.gmra.mxu3 %vm854_vm1, %v661_v33  ;;  %1521 = vmatmul.msk.bf16.gmra.mxu0 %vm854_vm1, %v661_v33 }
 0x100   :  { %1523 = vmatmul.msk.bf16.gmra.mxu1 %vm854_vm1, %v661_v33  ;;  %1525 = vmatmul.msk.bf16.gmra.mxu2 %vm854_vm1, %v661_v33 }
 0x10f   :  { %1526 = vmatmul.msk.bf16.vlgmr.msrb.gmra.mxu3 %vm854_vm1, %v660_v32  ;;  %1528 = vmatmul.msk.bf16.vlgmr.msrb.gmra.mxu0 %vm854_vm1, %v660_v32 }
 0x110   :  { %1530 = vmatmul.msk.bf16.vlgmr.msrb.gmra.mxu1 %vm854_vm1, %v660_v32 }
 0x11f   :  { %1527 = vmatmul.msk.bf16.gmra.mxu3 %vm854_vm1, %v661_v33  ;;  %1529 = vmatmul.msk.bf16.gmra.mxu0 %vm854_vm1, %v661_v33 }
 0x120   :  { %1531 = vmatmul.msk.bf16.gmra.mxu1 %vm854_vm1, %v661_v33 }
 0x16c   :  { %v889_v62 = vpop.f32.mrf.mxu0 }
 0x16d   :  { %v890_v63 = vadd.f32 %v889_v62, %v2238_v37  ;;  %v908_v0 = vpop.f32.mrf.mxu1 }
 0x16e   :  { %v909_v1 = vadd.f32 %v908_v0, %v2241_v52 }
 0x16f   :  { %v995_v4 = vmul.f32 0.5, %v890_v63 }
 0x170   :  { %v996_v2 = vmul.f32 0.5, %v909_v1 }
 0x171   :  { %1651 = vtanh.f32 %v995_v4 }
 0x172   :  { %1653 = vtanh.f32 %v996_v2  ;;  %v870_v7 = vpop.f32.mrf.mxu3 }
 0x173   :  { %v871_v8 = vadd.f32 %v870_v7, %v2246_v5  ;;  %v927_v9 = vpop.f32.mrf.mxu2 }
 0x174   :  { %v928_v10 = vadd.f32 %v927_v9, %v2249_v6  ;;  %v891_v11 = vpop.f32.mrf.mxu0 }
 0x175   :  { %v994_v12 = vmul.f32 0.5, %v871_v8  ;;  %v892_v13 = vadd.f32 %v891_v11, %v2238_v37  ;;  %v910_v14 = vpop.f32.mrf.mxu1 }
 0x176   :  { %v997_v3 = vmul.f32 0.5, %v928_v10  ;;  %v911_v15 = vadd.f32 %v910_v14, %v2241_v52 }
 0x177   :  { %v1652_v16 = vpop.eup %1651  ;;  %1655 = vtanh.f32 %v994_v12  ;;  %v1002_v17 = vmul.f32 0.5, %v892_v13 }
 0x178   :  { %v1654_v18 = vpop.eup %1653  ;;  %v1051_v19 = vmul.f32 0.5, %v1652_v16  ;;  %1657 = vtanh.f32 %v997_v3  ;;  %v1003_v20 = vmul.f32 0.5, %v911_v15 }
 0x179   :  { %v1052_v38 = vmul.f32 0.5, %v1654_v18  ;;  %1659 = vtanh.f32 %v1002_v17 }
 0x17a   :  { %v1079_v21 = vadd.f32 0.5, %v1051_v19  ;;  %1661 = vtanh.f32 %v1003_v20  ;;  %v872_v22 = vpop.f32.mrf.mxu3 }
 0x17b   :  { %v1080_v23 = vadd.f32 0.5, %v1052_v38  ;;  %v873_v24 = vadd.f32 %v872_v22, %v2246_v5  ;;  %v929_v25 = vpop.f32.mrf.mxu2 }
 0x17c   :  { %1107 = vst [vmem:[#allocation2 + $0x8] sm:$0xff] %v1079_v21  ;;  %v930_v26 = vadd.f32 %v929_v25, %v2249_v6  ;;  %v894_v27 = vpop.f32.mrf.mxu0 }
 0x17d   :  { %v1656_v28 = vpop.eup %1655  ;;  %1108 = vst [vmem:[#allocation2 + $0x10] sm:$0xff] %v1080_v23  ;;  %v1001_v29 = vmul.f32 0.5, %v873_v24  ;;  %v895_v30 = vadd.f32 %v894_v27, %v2238_v37  ;;  %v913_v39 = vpop.f32.mrf.mxu1  ;;  %v2274_v27 = vperm.slane %v2235_v61, 4 }
 0x17e   :  { %v1658_v40 = vpop.eup %1657  ;;  %v1050_v42 = vmul.f32 0.5, %v1656_v28  ;;  %v1004_v43 = vmul.f32 0.5, %v930_v26  ;;  %v914_v44 = vadd.f32 %v913_v39, %v2241_v52 }
 0x17f   :  { %v1660_v45 = vpop.eup %1659  ;;  %v1053_v46 = vmul.f32 0.5, %v1658_v40  ;;  %1663 = vtanh.f32 %v1001_v29  ;;  %v1009_v47 = vmul.f32 0.5, %v895_v30 }
 0x180   :  { %v1662_v48 = vpop.eup %1661  ;;  %v1078_v49 = vadd.f32 0.5, %v1050_v42  ;;  %v1058_v51 = vmul.f32 0.5, %v1660_v45  ;;  %1665 = vtanh.f32 %v1004_v43  ;;  %v1010_v53 = vmul.f32 0.5, %v914_v44 }
 0x181   :  { %v1081_v54 = vadd.f32 0.5, %v1053_v46  ;;  %v1059_v55 = vmul.f32 0.5, %v1662_v48  ;;  %1667 = vtanh.f32 %v1009_v47 }
 0x182   :  { %1106 = vst [vmem:[#allocation2] sm:$0xff] %v1078_v49  ;;  %v1086_v56 = vadd.f32 0.5, %v1058_v51  ;;  %1669 = vtanh.f32 %v1010_v53  ;;  %v875_v34 = vpop.f32.mrf.mxu3 }
 0x183   :  { %1109 = vst [vmem:[#allocation2 + $0x18] sm:$0xff] %v1081_v54  ;;  %v1087_v32 = vadd.f32 0.5, %v1059_v55  ;;  %v876_v57 = vadd.f32 %v875_v34, %v2246_v5  ;;  %v932_v41 = vpop.f32.mrf.mxu2 }
 0x184   :  { %1114 = vst [vmem:[#allocation2 + $0x40] sm:$0xff] %v1086_v56  ;;  %v933_v58 = vadd.f32 %v932_v41, %v2249_v6  ;;  %v896_v59 = vpop.f32.mrf.mxu0 }
 0x185   :  { %v1664_v35 = vpop.eup %1663  ;;  %1115 = vst [vmem:[#allocation2 + $0x48] sm:$0xff] %v1087_v32  ;;  %v1008_v60 = vmul.f32 0.5, %v876_v57  ;;  %v897_v31 = vadd.f32 %v896_v59, %v2238_v37  ;;  %v915_v36 = vpop.f32.mrf.mxu1  ;;  %v2264_v37 = vperm.slane %v2235_v61, 5 }
 0x186   :  { %v1666_v50 = vpop.eup %1665  ;;  %v1057_v33 = vmul.f32 0.5, %v1664_v35  ;;  %v1011_v62 = vmul.f32 0.5, %v933_v58  ;;  %v916_v63 = vadd.f32 %v915_v36, %v2241_v52  ;;  %v2267_v52 = vperm.slane %v2235_v61, 6 }
 0x187   :  { %v1668_v0 = vpop.eup %1667  ;;  %v1060_v1 = vmul.f32 0.5, %v1666_v50  ;;  %1671 = vtanh.f32 %v1008_v60  ;;  %v1016_v4 = vmul.f32 0.5, %v897_v31 }
 0x188   :  { %v1670_v2 = vpop.eup %1669  ;;  %v1085_v7 = vadd.f32 0.5, %v1057_v33  ;;  %v1065_v8 = vmul.f32 0.5, %v1668_v0  ;;  %1673 = vtanh.f32 %v1011_v62  ;;  %v1017_v9 = vmul.f32 0.5, %v916_v63 }
 0x189   :  { %v1088_v10 = vadd.f32 0.5, %v1060_v1  ;;  %v1066_v11 = vmul.f32 0.5, %v1670_v2  ;;  %1675 = vtanh.f32 %v1016_v4 }
 0x18a   :  { %1113 = vst [vmem:[#allocation2 + $0x38] sm:$0xff] %v1085_v7  ;;  %v1093_v12 = vadd.f32 0.5, %v1065_v8  ;;  %1677 = vtanh.f32 %v1017_v9  ;;  %v877_v13 = vpop.f32.mrf.mxu3 }
 0x18b   :  { %1116 = vst [vmem:[#allocation2 + $0x50] sm:$0xff] %v1088_v10  ;;  %v1094_v14 = vadd.f32 0.5, %v1066_v11  ;;  %v878_v3 = vadd.f32 %v877_v13, %v2246_v5  ;;  %v934_v15 = vpop.f32.mrf.mxu2 }
 0x18c   :  { %1121 = vst [vmem:[#allocation2 + $0x78] sm:$0xff] %v1093_v12  ;;  %v935_v16 = vadd.f32 %v934_v15, %v2249_v6  ;;  %v965_v17 = vpop.f32.mrf.mxu0 }
 0x18d   :  { %v1672_v18 = vpop.eup %1671  ;;  %1122 = vst [vmem:[#allocation2 + $0x80] sm:$0xff] %v1094_v14  ;;  %v1015_v19 = vmul.f32 0.5, %v878_v3  ;;  %v966_v20 = vadd.f32 %v965_v17, %v2264_v37  ;;  %v984_v38 = vpop.f32.mrf.mxu1 }
 0x18e   :  { %v1674_v21 = vpop.eup %1673  ;;  %v1064_v22 = vmul.f32 0.5, %v1672_v18  ;;  %v1018_v23 = vmul.f32 0.5, %v935_v16  ;;  %v985_v24 = vadd.f32 %v984_v38, %v2267_v52 }
 0x18f   :  { %v1676_v25 = vpop.eup %1675  ;;  %v1067_v26 = vmul.f32 0.5, %v1674_v21  ;;  %1679 = vtanh.f32 %v1015_v19  ;;  %v999_v5 = vmul.f32 0.5, %v966_v20 }
 0x190   :  { %v1678_v6 = vpop.eup %1677  ;;  %v1092_v28 = vadd.f32 0.5, %v1064_v22  ;;  %v1072_v29 = vmul.f32 0.5, %v1676_v25  ;;  %1681 = vtanh.f32 %v1018_v23  ;;  %v1000_v30 = vmul.f32 0.5, %v985_v24 }
 0x191   :  { %v1095_v39 = vadd.f32 0.5, %v1067_v26  ;;  %v1073_v40 = vmul.f32 0.5, %v1678_v6  ;;  %1683 = vtanh.f32 %v999_v5 }
 0x192   :  { %1120 = vst [vmem:[#allocation2 + $0x70] sm:$0xff] %v1092_v28  ;;  %v1100_v42 = vadd.f32 0.5, %v1072_v29  ;;  %1685 = vtanh.f32 %v1000_v30  ;;  %v946_v43 = vpop.f32.mrf.mxu3 }
 0x193   :  { %1123 = vst [vmem:[#allocation2 + $0x88] sm:$0xff] %v1095_v39  ;;  %v1101_v44 = vadd.f32 0.5, %v1073_v40  ;;  %v947_v45 = vadd.f32 %v946_v43, %v2274_v27 }
 0x194   :  { %1128 = vst [vmem:[#allocation2 + $0xb0] sm:$0xff] %v1100_v42  ;;  %v967_v46 = vpop.f32.mrf.mxu0 }
 0x195   :  { %v1680_v61 = vpop.eup %1679  ;;  %1129 = vst [vmem:[#allocation2 + $0xb8] sm:$0xff] %v1101_v44  ;;  %v998_v47 = vmul.f32 0.5, %v947_v45  ;;  %v968_v48 = vadd.f32 %v967_v46, %v2264_v37  ;;  %v986_v49 = vpop.f32.mrf.mxu1 }
 0x196   :  { %v1682_v51 = vpop.eup %1681  ;;  %v1071_v53 = vmul.f32 0.5, %v1680_v61  ;;  %v987_v54 = vadd.f32 %v986_v49, %v2267_v52 }
 0x197   :  { %v1684_v55 = vpop.eup %1683  ;;  %v1074_v56 = vmul.f32 0.5, %v1682_v51  ;;  %1687 = vtanh.f32 %v998_v47  ;;  %v1006_v34 = vmul.f32 0.5, %v968_v48 }
 0x198   :  { %v1686_v32 = vpop.eup %1685  ;;  %v1099_v57 = vadd.f32 0.5, %v1071_v53  ;;  %v1055_v41 = vmul.f32 0.5, %v1684_v55  ;;  %v1007_v58 = vmul.f32 0.5, %v987_v54 }
 0x199   :  { %v1102_v59 = vadd.f32 0.5, %v1074_v56  ;;  %v1056_v35 = vmul.f32 0.5, %v1686_v32  ;;  %1689 = vtanh.f32 %v1006_v34 }
 0x19a   :  { %1127 = vst [vmem:[#allocation2 + $0xa8] sm:$0xff] %v1099_v57  ;;  %v1083_v60 = vadd.f32 0.5, %v1055_v41  ;;  %1691 = vtanh.f32 %v1007_v58  ;;  %v948_v31 = vpop.f32.mrf.mxu3 }
 0x19b   :  { %1130 = vst [vmem:[#allocation2 + $0xc0] sm:$0xff] %v1102_v59  ;;  %v1084_v36 = vadd.f32 0.5, %v1056_v35  ;;  %v949_v50 = vadd.f32 %v948_v31, %v2274_v27 }
 0x19c   :  { %1111 = vst [vmem:[#allocation2 + $0x28] sm:$0xff] %v1083_v60  ;;  %v970_v33 = vpop.f32.mrf.mxu0 }
 0x19d   :  { %v1688_v62 = vpop.eup %1687  ;;  %1112 = vst.msk [vmem:[#allocation2 + $0x30] sm:$0xff] %vm504_vm0, %v1084_v36  ;;  %v1005_v63 = vmul.f32 0.5, %v949_v50  ;;  %v971_v0 = vadd.f32 %v970_v33, %v2264_v37  ;;  %v989_v1 = vpop.f32.mrf.mxu1 }
 0x19e   :  { %v1054_v4 = vmul.f32 0.5, %v1688_v62  ;;  %v990_v2 = vadd.f32 %v989_v1, %v2267_v52 }
 0x19f   :  { %v1690_v7 = vpop.eup %1689  ;;  %1693 = vtanh.f32 %v1005_v63  ;;  %v1013_v8 = vmul.f32 0.5, %v971_v0 }
 0x1a0   :  { %v1692_v9 = vpop.eup %1691  ;;  %v1082_v10 = vadd.f32 0.5, %v1054_v4  ;;  %v1062_v11 = vmul.f32 0.5, %v1690_v7  ;;  %v1014_v12 = vmul.f32 0.5, %v990_v2 }
 0x1a1   :  { %v1063_v13 = vmul.f32 0.5, %v1692_v9  ;;  %1695 = vtanh.f32 %v1013_v8 }
 0x1a2   :  { %1110 = vst [vmem:[#allocation2 + $0x20] sm:$0xff] %v1082_v10  ;;  %v1090_v14 = vadd.f32 0.5, %v1062_v11  ;;  %1697 = vtanh.f32 %v1014_v12  ;;  %v951_v3 = vpop.f32.mrf.mxu3 }
 0x1a3   :  { %v1091_v15 = vadd.f32 0.5, %v1063_v13  ;;  %v952_v16 = vadd.f32 %v951_v3, %v2274_v27 }
 0x1a4   :  { %1118 = vst [vmem:[#allocation2 + $0x60] sm:$0xff] %v1090_v14  ;;  %v972_v17 = vpop.f32.mrf.mxu0 }
 0x1a5   :  { %v1694_v18 = vpop.eup %1693  ;;  %1119 = vst.msk [vmem:[#allocation2 + $0x68] sm:$0xff] %vm504_vm0, %v1091_v15  ;;  %v1012_v19 = vmul.f32 0.5, %v952_v16  ;;  %v973_v20 = vadd.f32 %v972_v17, %v2264_v37  ;;  %v991_v38 = vpop.f32.mrf.mxu1 }
 0x1a6   :  { %v1061_v21 = vmul.f32 0.5, %v1694_v18  ;;  %v992_v22 = vadd.f32 %v991_v38, %v2267_v52 }
 0x1a7   :  { %v1696_v23 = vpop.eup %1695  ;;  %1699 = vtanh.f32 %v1012_v19  ;;  %v1020_v24 = vmul.f32 0.5, %v973_v20 }
 0x1a8   :  { %v1698_v25 = vpop.eup %1697  ;;  %v1089_v26 = vadd.f32 0.5, %v1061_v21  ;;  %v1069_v5 = vmul.f32 0.5, %v1696_v23  ;;  %v1021_v6 = vmul.f32 0.5, %v992_v22 }
 0x1a9   :  { %v1070_v28 = vmul.f32 0.5, %v1698_v25  ;;  %1701 = vtanh.f32 %v1020_v24 }
 0x1aa   :  { %1117 = vst [vmem:[#allocation2 + $0x58] sm:$0xff] %v1089_v26  ;;  %v1097_v29 = vadd.f32 0.5, %v1069_v5  ;;  %1703 = vtanh.f32 %v1021_v6  ;;  %v953_v30 = vpop.f32.mrf.mxu3 }
 0x1ab   :  { %v1098_v39 = vadd.f32 0.5, %v1070_v28  ;;  %v954_v37 = vadd.f32 %v953_v30, %v2274_v27 }
 0x1ac   :  { %1125 = vst [vmem:[#allocation2 + $0x98] sm:$0xff] %v1097_v29 }
 0x1ad   :  { %v1700_v40 = vpop.eup %1699  ;;  %1126 = vst.msk [vmem:[#allocation2 + $0xa0] sm:$0xff] %vm504_vm0, %v1098_v39  ;;  %v1019_v52 = vmul.f32 0.5, %v954_v37 }
 0x1ae   :  { %v1068_v42 = vmul.f32 0.5, %v1700_v40 }
 0x1af   :  { %v1702_v43 = vpop.eup %1701  ;;  %1705 = vtanh.f32 %v1019_v52 }
 0x1b0   :  { %v1704_v44 = vpop.eup %1703  ;;  %v1096_v45 = vadd.f32 0.5, %v1068_v42  ;;  %v1076_v46 = vmul.f32 0.5, %v1702_v43 }
 0x1b1   :  { %v1077_v61 = vmul.f32 0.5, %v1704_v44 }
 0x1b2   :  { %1124 = vst [vmem:[#allocation2 + $0x90] sm:$0xff] %v1096_v45  ;;  %v1104_v47 = vadd.f32 0.5, %v1076_v46 }
 0x1b3   :  { %v1105_v48 = vadd.f32 0.5, %v1077_v61 }
 0x1b4   :  { %1132 = vst [vmem:[#allocation2 + $0xd0] sm:$0xff] %v1104_v47 }
 0x1b5   :  { %v1706_v27 = vpop.eup %1705  ;;  %1133 = vst.msk [vmem:[#allocation2 + $0xd8] sm:$0xff] %vm504_vm0, %v1105_v48 }
 0x1b6   :  { %v1075_v49 = vmul.f32 0.5, %v1706_v27 }
 0x1b8   :  { %v1103_v51 = vadd.f32 0.5, %v1075_v49 }
 0x1ba   :  { %1131 = vst [vmem:[#allocation2 + $0xc8] sm:$0xff] %v1103_v51 }
 0x1bb   :  { %1146 = dma.vmem_to_hbm [thread:$0]  %s1139_s23, 3584, %s1141_s26, [#allocation3], %s1734_s27, %s1734_s27, %s1735_s28  }
 0x1bc   :  { %1731 = dma.done.wait [#allocation3], 3584  }
 0x1bd   :  { %1732 = vsyncadd [#allocation3], 4294963712 }
 0x1be   :  { %1151 = vsyncpa [#allocation3], 1 }

</bundles_post_ra>
